<compile_context>
chip_gen: v7x
topology: tpu7x:2x2x1
jax: 0.10.0
libtpu: 0.0.40
codegen_flags: <defaults>
</compile_context>

<pallas_src>
import jax
import jax.numpy as jnp
from jax.experimental import pallas as pl
from jax.experimental.pallas import tpu as pltpu

_LANE = 128
_SUBLANE = 8
_BF16_SUBLANE = 16  # bf16 packs 16 rows per vreg


def _round_up(x, m):
    return ((x + m - 1) // m) * m


def _make_policy_kernel(n_mid):
    """Kernel body for a fixed (unrolled) number of hidden layers (1 + n_mid)."""

    def kernel(*refs):
        x_ref, w_in_ref, b_in_ref = refs[0], refs[1], refs[2]
        idx = 3
        if n_mid > 0:
            w_mid_ref, b_mid_ref = refs[3], refs[4]
            idx = 5
        w_head_ref, b_head_ref, o_ref = refs[idx], refs[idx + 1], refs[idx + 2]

        # Layer 0: bf16 operands on the MXU, f32 accumulate, f32 activation.
        z = jnp.dot(x_ref[...], w_in_ref[...], preferred_element_type=jnp.float32)
        h = jnp.tanh(z + b_in_ref[...])

        # Remaining hidden layers (statically unrolled).
        for i in range(n_mid):
            z = jnp.dot(h.astype(jnp.bfloat16), w_mid_ref[i],
                        preferred_element_type=jnp.float32)
            h = jnp.tanh(z + b_mid_ref[i])

        # Fused output heads: one matmul, one sigmoid, one lane-dense store.
        z = jnp.dot(h.astype(jnp.bfloat16), w_head_ref[...],
                    preferred_element_type=jnp.float32)
        z = z + b_head_ref[...]
        # sigmoid(z) == 0.5 * (tanh(0.5 * z) + 1)  (EUP tanh, no VALU divide)
        o_ref[...] = 0.5 * (jnp.tanh(0.5 * z) + 1.0)

    return kernel


def policy_net_forward(x, hidden_params, head_params):
    """PolicyNet forward in a single Pallas TPU kernel.

    x             : [B, N_inputs] float32
    hidden_params : list of (W [in, out], b [1, out]) for the hidden stack
    head_params   : list of (W [N_nodes, N_out_i], b [1, N_out_i]) per field
    returns       : tuple of [B, N_out_i] float32 arrays (one per output head)
    """
    n_hidden = len(hidden_params)
    n_mid = n_hidden - 1
    head_widths = [w.shape[1] for w, _ in head_params]
    total_out = sum(head_widths)

    batch, n_inputs = x.shape
    n_nodes = hidden_params[0][0].shape[1]

    # Per-dimension padded sizes (no uniform P = max(...) inflation).
    K_in = _round_up(n_inputs, _BF16_SUBLANE)      # layer-0 contraction dim
    P_hid = _round_up(n_nodes, _LANE)              # hidden width
    P_out = _round_up(total_out, _LANE)            # fused head width

    # ---- Pack parameters (host side, once). Weights bf16, biases f32. ------
    w0, b0 = hidden_params[0]
    w_in = (jnp.zeros((K_in, P_hid), jnp.bfloat16)
            .at[:n_inputs, :n_nodes].set(w0.astype(jnp.bfloat16)))
    b_in = jnp.zeros((1, P_hid), jnp.float32).at[0, :n_nodes].set(b0.reshape(-1))

    if n_mid > 0:
        w_mid = jnp.stack([
            jnp.zeros((P_hid, P_hid), jnp.bfloat16)
            .at[:n_nodes, :n_nodes].set(w.astype(jnp.bfloat16))
            for w, _ in hidden_params[1:]
        ])                                          # [n_mid, P_hid, P_hid]
        b_mid = jnp.stack([
            jnp.zeros((1, P_hid), jnp.float32).at[0, :n_nodes].set(b.reshape(-1))
            for _, b in hidden_params[1:]
        ])                                          # [n_mid, 1, P_hid]

    # Fuse all output heads into one slab (concatenate along output columns).
    w_h = jnp.concatenate([w for w, _ in head_params], axis=1)       # [N_nodes, total_out]
    b_h = jnp.concatenate([b.reshape(-1) for _, b in head_params])   # [total_out]
    w_head = (jnp.zeros((P_hid, P_out), jnp.bfloat16)
              .at[:n_nodes, :total_out].set(w_h.astype(jnp.bfloat16)))
    b_head = jnp.zeros((1, P_out), jnp.float32).at[0, :total_out].set(b_h)

    # ---- Batch tiling: TB up to 512 rows, 1-D parallel grid. ---------------
    B_pad = _round_up(batch, _SUBLANE)
    if B_pad > 512:
        TB = 512
        B_pad = _round_up(B_pad, TB)
    else:
        TB = B_pad
    # x stays at (near-)natural feature width in HBM, stored bf16.
    x_pad = (jnp.zeros((B_pad, K_in), jnp.bfloat16)
             .at[:batch, :n_inputs].set(x.astype(jnp.bfloat16)))

    kernel = _make_policy_kernel(n_mid)

    in_specs = [
        pl.BlockSpec((TB, K_in), lambda i: (i, 0)),
        # Constant block index -> packed weights stay VMEM-resident across the
        # batch grid (no re-DMA between iterations).
        pl.BlockSpec((K_in, P_hid), lambda i: (0, 0)),
        pl.BlockSpec((1, P_hid), lambda i: (0, 0)),
    ]
    inputs = [x_pad, w_in, b_in]
    if n_mid > 0:
        in_specs += [
            pl.BlockSpec((n_mid, P_hid, P_hid), lambda i: (0, 0, 0)),
            pl.BlockSpec((n_mid, 1, P_hid), lambda i: (0, 0, 0)),
        ]
        inputs += [w_mid, b_mid]
    in_specs += [
        pl.BlockSpec((P_hid, P_out), lambda i: (0, 0)),
        pl.BlockSpec((1, P_out), lambda i: (0, 0)),
    ]
    inputs += [w_head, b_head]

    out = pl.pallas_call(
        kernel,
        out_shape=jax.ShapeDtypeStruct((B_pad, P_out), jnp.float32),
        grid_spec=pltpu.PrefetchScalarGridSpec(
            num_scalar_prefetch=0,
            grid=(B_pad // TB,),
            in_specs=in_specs,
            out_specs=pl.BlockSpec((TB, P_out), lambda i: (i, 0)),
        ),
        compiler_params=pltpu.CompilerParams(
            dimension_semantics=("parallel",),
            vmem_limit_bytes=32 * 1024 * 1024,
        ),
    )(*inputs)

    # Split the fused lane-dense output back into per-head results.
    # (Padded head columns hold sigmoid(0)=0.5 and are sliced away here.)
    results = []
    off = 0
    for w in head_widths:
        results.append(out[:batch, off: off + w])
        off += w
    return tuple(results)


def _init_linear(key, fan_in, fan_out):
    """Deterministic init mimicking torch.nn.Linear default U[-1/sqrt(fan_in), +)."""
    kw, kb = jax.random.split(key)
    bound = 1.0 / jnp.sqrt(jnp.float32(fan_in))
    w = jax.random.uniform(kw, (fan_in, fan_out), jnp.float32, -bound, bound)
    b = jax.random.uniform(kb, (1, fan_out), jnp.float32, -bound, bound)
    return w, b


def _reference_forward(x, hidden_params, head_params):
    h = x
    for w, b in hidden_params:
        h = jnp.tanh(h @ w + b)
    return tuple(jax.nn.sigmoid(h @ w + b) for w, b in head_params)


if __name__ == "__main__":
    # Module hyperparameters (small, consistent with the constructor signature).
    N_inputs = 16
    N_nodes = 32
    N_layers = 2
    N_fields = 2
    N_outputs = (8, 4)
    batch = 2

    key = jax.random.PRNGKey(0)
    keys = jax.random.split(key, 1 + N_layers + N_fields)

    x = jax.random.normal(keys[0], (batch, N_inputs), jnp.float32)

    hidden_params = []
    fan_in = N_inputs
    for i in range(N_layers):
        hidden_params.append(_init_linear(keys[1 + i], fan_in, N_nodes))
        fan_in = N_nodes

    head_params = []
    for i in range(N_fields):
        head_params.append(
            _init_linear(keys[1 + N_layers + i], N_nodes, N_outputs[i])
        )

    outs = policy_net_forward(x, hidden_params, head_params)
    outs = jax.block_until_ready(outs)

    # Reference is f32; kernel uses bf16 MXU operands -> relaxed tolerance.
    refs = _reference_forward(x, hidden_params, head_params)
    for o, r in zip(outs, refs):
        assert o.shape == r.shape, (o.shape, r.shape)
        assert jnp.allclose(o, r, atol=3e-2, rtol=3e-2), "mismatch vs reference"

    print("KERNEL_OK")
</pallas_src>

<mosaic_0001>
module attributes {stable_mosaic.version = 11 : i64} {
  func.func @kernel(%arg0: i32, %arg1: memref<8x16xbf16, #tpu.memory_space<vmem>>, %arg2: memref<16x128xbf16, #tpu.memory_space<vmem>>, %arg3: memref<1x128xf32, #tpu.memory_space<vmem>>, %arg4: memref<1x128x128xbf16, #tpu.memory_space<vmem>>, %arg5: memref<1x1x128xf32, #tpu.memory_space<vmem>>, %arg6: memref<128x128xbf16, #tpu.memory_space<vmem>>, %arg7: memref<1x128xf32, #tpu.memory_space<vmem>>, %arg8: memref<8x128xf32, #tpu.memory_space<vmem>>) attributes {dimension_semantics = [#tpu.dimension_semantics<parallel>], iteration_bounds = array<i64: 1>, scalar_prefetch = 0 : i64, scratch_operands = 0 : i64, tpu.core_type = #tpu.core_type<tc>, window_params = [{transform_indices = @transform_0, window_bounds = array<i64: 8, 16>}, {pipeline_mode = #tpu.pipeline_mode<synchronous>, transform_indices = @transform_1, window_bounds = array<i64: 16, 128>}, {pipeline_mode = #tpu.pipeline_mode<synchronous>, transform_indices = @transform_2, window_bounds = array<i64: 1, 128>}, {pipeline_mode = #tpu.pipeline_mode<synchronous>, transform_indices = @transform_3, window_bounds = array<i64: 1, 128, 128>}, {pipeline_mode = #tpu.pipeline_mode<synchronous>, transform_indices = @transform_4, window_bounds = array<i64: 1, 1, 128>}, {pipeline_mode = #tpu.pipeline_mode<synchronous>, transform_indices = @transform_5, window_bounds = array<i64: 128, 128>}, {pipeline_mode = #tpu.pipeline_mode<synchronous>, transform_indices = @transform_6, window_bounds = array<i64: 1, 128>}, {transform_indices = @transform_7, window_bounds = array<i64: 8, 128>}]} {
    %c0 = arith.constant 0 : index
    %c0_0 = arith.constant 0 : index
    %0 = vector.load %arg1[%c0, %c0_0] : memref<8x16xbf16, #tpu.memory_space<vmem>>, vector<8x16xbf16>
    %c0_1 = arith.constant 0 : index
    %c0_2 = arith.constant 0 : index
    %1 = vector.load %arg2[%c0_1, %c0_2] : memref<16x128xbf16, #tpu.memory_space<vmem>>, vector<16x128xbf16>
    %cst = arith.constant dense<0.000000e+00> : vector<8x128xf32>
    %2 = tpu.matmul %0, %1, %cst {dimension_numbers = #tpu.dot_dimension_numbers<[1], [0], [0], [1], [0, 0, 1, 1], [], []>} : vector<8x16xbf16>, vector<16x128xbf16>, vector<8x128xf32> -> vector<8x128xf32>
    %c0_3 = arith.constant 0 : index
    %c0_4 = arith.constant 0 : index
    %3 = vector.load %arg3[%c0_3, %c0_4] : memref<1x128xf32, #tpu.memory_space<vmem>>, vector<1x128xf32>
    %4 = vector.broadcast %3 : vector<1x128xf32> to vector<8x128xf32>
    %5 = arith.addf %2, %4 : vector<8x128xf32>
    %6 = math.tanh %5 : vector<8x128xf32>
    %7 = arith.truncf %6 : vector<8x128xf32> to vector<8x128xbf16>
    %c0_5 = arith.constant 0 : index
    %c0_6 = arith.constant 0 : index
    %c0_7 = arith.constant 0 : index
    %8 = vector.load %arg4[%c0_5, %c0_6, %c0_7] : memref<1x128x128xbf16, #tpu.memory_space<vmem>>, vector<1x128x128xbf16>
    %9 = vector.shape_cast %8 : vector<1x128x128xbf16> to vector<128x128xbf16>
    %cst_8 = arith.constant dense<0.000000e+00> : vector<8x128xf32>
    %10 = tpu.matmul %7, %9, %cst_8 {dimension_numbers = #tpu.dot_dimension_numbers<[1], [0], [0], [1], [0, 0, 1, 1], [], []>} : vector<8x128xbf16>, vector<128x128xbf16>, vector<8x128xf32> -> vector<8x128xf32>
    %c0_9 = arith.constant 0 : index
    %c0_10 = arith.constant 0 : index
    %c0_11 = arith.constant 0 : index
    %11 = vector.load %arg5[%c0_9, %c0_10, %c0_11] : memref<1x1x128xf32, #tpu.memory_space<vmem>>, vector<1x1x128xf32>
    %12 = vector.shape_cast %11 : vector<1x1x128xf32> to vector<1x128xf32>
    %13 = vector.broadcast %12 : vector<1x128xf32> to vector<8x128xf32>
    %14 = arith.addf %10, %13 : vector<8x128xf32>
    %15 = math.tanh %14 : vector<8x128xf32>
    %16 = arith.truncf %15 : vector<8x128xf32> to vector<8x128xbf16>
    %c0_12 = arith.constant 0 : index
    %c0_13 = arith.constant 0 : index
    %17 = vector.load %arg6[%c0_12, %c0_13] : memref<128x128xbf16, #tpu.memory_space<vmem>>, vector<128x128xbf16>
    %cst_14 = arith.constant dense<0.000000e+00> : vector<8x128xf32>
    %18 = tpu.matmul %16, %17, %cst_14 {dimension_numbers = #tpu.dot_dimension_numbers<[1], [0], [0], [1], [0, 0, 1, 1], [], []>} : vector<8x128xbf16>, vector<128x128xbf16>, vector<8x128xf32> -> vector<8x128xf32>
    %c0_15 = arith.constant 0 : index
    %c0_16 = arith.constant 0 : index
    %19 = vector.load %arg7[%c0_15, %c0_16] : memref<1x128xf32, #tpu.memory_space<vmem>>, vector<1x128xf32>
    %20 = vector.broadcast %19 : vector<1x128xf32> to vector<8x128xf32>
    %21 = arith.addf %18, %20 : vector<8x128xf32>
    %cst_17 = arith.constant 5.000000e-01 : f32
    %22 = vector.broadcast %cst_17 : f32 to vector<8x128xf32>
    %23 = arith.mulf %22, %21 : vector<8x128xf32>
    %24 = math.tanh %23 : vector<8x128xf32>
    %cst_18 = arith.constant 1.000000e+00 : f32
    %25 = vector.broadcast %cst_18 : f32 to vector<8x128xf32>
    %26 = arith.addf %24, %25 : vector<8x128xf32>
    %cst_19 = arith.constant 5.000000e-01 : f32
    %27 = vector.broadcast %cst_19 : f32 to vector<8x128xf32>
    %28 = arith.mulf %27, %26 : vector<8x128xf32>
    %c0_20 = arith.constant 0 : index
    %c0_21 = arith.constant 0 : index
    %29 = vector.load %arg8[%c0_20, %c0_21] : memref<8x128xf32, #tpu.memory_space<vmem>>, vector<8x128xf32>
    tpu.vector_store %arg8[%c0_20, %c0_21], %28 {strides = array<i32>} : memref<8x128xf32, #tpu.memory_space<vmem>>, vector<8x128xf32>,
    return
  }
  func.func @transform_0(%arg0: i32) -> (i32, i32) {
    %c0_i32 = arith.constant 0 : i32
    %c0_i32_0 = arith.constant 0 : i32
    return %arg0, %c0_i32 : i32, i32
  }
  func.func @transform_1(%arg0: i32) -> (i32, i32) {
    %c0_i32 = arith.constant 0 : i32
    %c0_i32_0 = arith.constant 0 : i32
    %c0_i32_1 = arith.constant 0 : i32
    return %c0_i32, %c0_i32_0 : i32, i32
  }
  func.func @transform_2(%arg0: i32) -> (i32, i32) {
    %c0_i32 = arith.constant 0 : i32
    %c0_i32_0 = arith.constant 0 : i32
    %c0_i32_1 = arith.constant 0 : i32
    return %c0_i32, %c0_i32_0 : i32, i32
  }
  func.func @transform_3(%arg0: i32) -> (i32, i32, i32) {
    %c0_i32 = arith.constant 0 : i32
    %c0_i32_0 = arith.constant 0 : i32
    %c0_i32_1 = arith.constant 0 : i32
    %c0_i32_2 = arith.constant 0 : i32
    return %c0_i32, %c0_i32_0, %c0_i32_1 : i32, i32, i32
  }
  func.func @transform_4(%arg0: i32) -> (i32, i32, i32) {
    %c0_i32 = arith.constant 0 : i32
    %c0_i32_0 = arith.constant 0 : i32
    %c0_i32_1 = arith.constant 0 : i32
    %c0_i32_2 = arith.constant 0 : i32
    return %c0_i32, %c0_i32_0, %c0_i32_1 : i32, i32, i32
  }
  func.func @transform_5(%arg0: i32) -> (i32, i32) {
    %c0_i32 = arith.constant 0 : i32
    %c0_i32_0 = arith.constant 0 : i32
    %c0_i32_1 = arith.constant 0 : i32
    return %c0_i32, %c0_i32_0 : i32, i32
  }
  func.func @transform_6(%arg0: i32) -> (i32, i32) {
    %c0_i32 = arith.constant 0 : i32
    %c0_i32_0 = arith.constant 0 : i32
    %c0_i32_1 = arith.constant 0 : i32
    return %c0_i32, %c0_i32_0 : i32, i32
  }
  func.func @transform_7(%arg0: i32) -> (i32, i32) {
    %c0_i32 = arith.constant 0 : i32
    %c0_i32_0 = arith.constant 0 : i32
    return %arg0, %c0_i32 : i32, i32
  }
}

</mosaic_0001>

<bundles_post_ra>
// kernel: tpu_custom_call.1
= control target key start
LH: loop header
LB: loop body
LE: loop exit
PB: predicated region body
PF: predicated region fallthrough
CT: control target
= control target key end

     0   :  { %12 = vsyncpa [#allocation3], 0  ;;  %s773_s0 = inlined_call_operand.hbm [shape: bf16[8,16], index: 0, kind: input, shape index: {}]   ;;  %s774_s1 = inlined_call_operand.hbm [shape: bf16[16,128], index: 1, kind: input, shape index: {}]   ;;  %s775_s2 = inlined_call_operand.vmem [shape: f32[1,128], index: 2, kind: input, shape index: {}]   ;;  %s776_s3 = inlined_call_operand.hbm [shape: bf16[1,128,128], index: 3, kind: input, shape index: {}]   ;;  %s777_s4 = inlined_call_operand.vmem [shape: f32[1,1,128], index: 4, kind: input, shape index: {}]   ;;  %s778_s5 = inlined_call_operand.hbm [shape: bf16[128,128], index: 5, kind: input, shape index: {}]   ;;  %s779_s6 = inlined_call_operand.vmem [shape: f32[1,128], index: 6, kind: input, shape index: {}]   ;;  %s780_s7 = inlined_call_operand.hbm [shape: f32[8,128], index: 7, kind: output, shape index: {}]  }
   0x1   :  { %13 = vsyncpa [#allocation6], 0 }
   0x2   :  { %14 = vsyncpa [#allocation9], 0 }
   0x3   :  { %15 = vsyncpa [#allocation4], 0  ;;  %s626_s24 = smov [#allocation5]   ;;  %s508_s28 = scalar_lea.hbm %s774_s1, 128 }
   0x4   :  { %s31_s25 = sshll.u32 %s626_s24, 4  ;;  %p509_p0 = scmp.ne.s32.totalorder %s774_s1, %s508_s28  ;;  %s32_s25 = int_to_ptr.vmem [resolvable:$true] %s31_s25 }
   0x5   :  { %p512_p1 = scmp.lt.u32.totalorder %s508_s28, %s774_s1 }
   0x7   :  { %p514_p2 = pnand %p512_p1, %p509_p0 }
   0x9   :  { %517 = shalt.err (!%p514_p2)
}
   0xa   :  { %s518_s10 = scalar_lea.vmem %s32_s25, 128  ;;  %p523_p4 = scmp.lt.s32.totalorder %s32_s25, %s32_s25 }
   0xb   :  { %p519_p3 = scmp.ne.s32.totalorder %s32_s25, %s518_s10  ;;  %p524_p5 = scmp.lt.s32.totalorder %s518_s10, %s518_s10 }
   0xd   :  { %p525_p6 = por %p524_p5, %p523_p4 }
   0xf   :  { %p526_p7 = pnand %p525_p6, %p519_p3 }
  0x11   :  { %529 = shalt.err (!%p526_p7)
}
  0x12   :  { %s627_s11 = smov 64   ;;  %s628_s12 = smov 4  }
  0x13   :  { %37 = dma.hbm_to_vmem [thread:$0]  %s774_s1, 128, %s32_s25, [#allocation6], %s627_s11, %s627_s11, %s628_s12  }
  0x14   :  { %s629_s15 = smov [#allocation2]   ;;  %s630_s17 = smov [#allocation7]  }
  0x15   :  { %s22_s16 = sshll.u32 %s629_s15, 4  ;;  %s45_s18 = sshll.u32 %s630_s17, 4  ;;  %s23_s16 = int_to_ptr.vmem [resolvable:$true] %s22_s16  ;;  %s46_s18 = int_to_ptr.vmem [resolvable:$true] %s45_s18 }
  0x16   :  { %s530_s21 = scalar_lea.hbm %s773_s0, 64 }
  0x17   :  { %p531_p8 = scmp.ne.s32.totalorder %s773_s0, %s530_s21  ;;  %p534_p9 = scmp.lt.u32.totalorder %s530_s21, %s773_s0 }
  0x19   :  { %p536_p10 = pnand %p534_p9, %p531_p8 }
  0x1b   :  { %539 = shalt.err (!%p536_p10)
}
  0x1c   :  { %s540_s1 = scalar_lea.vmem %s23_s16, 64  ;;  %p545_p12 = scmp.lt.s32.totalorder %s23_s16, %s23_s16 }
  0x1d   :  { %p541_p11 = scmp.ne.s32.totalorder %s23_s16, %s540_s1  ;;  %p546_p13 = scmp.lt.s32.totalorder %s540_s1, %s540_s1 }
  0x1f   :  { %p547_p0 = por %p546_p13, %p545_p12 }
  0x21   :  { %p548_p1 = pnand %p547_p0, %p541_p11 }
  0x23   :  { %551 = shalt.err (!%p548_p1)
}
  0x24   :  { %25 = dma.hbm_to_vmem [thread:$0]  %s773_s0, 64, %s23_s16, [#allocation3]  }
  0x25   :  { %s552_s30 = scalar_lea.hbm %s776_s3, 1024 }
  0x26   :  { %p553_p2 = scmp.ne.s32.totalorder %s776_s3, %s552_s30  ;;  %p556_p3 = scmp.lt.u32.totalorder %s552_s30, %s776_s3 }
  0x28   :  { %p558_p4 = pnand %p556_p3, %p553_p2 }
  0x2a   :  { %561 = shalt.err (!%p558_p4)
}
  0x2b   :  { %s562_s14 = scalar_lea.vmem %s46_s18, 1024  ;;  %p567_p6 = scmp.lt.s32.totalorder %s46_s18, %s46_s18 }
  0x2c   :  { %p563_p5 = scmp.ne.s32.totalorder %s46_s18, %s562_s14  ;;  %p568_p7 = scmp.lt.s32.totalorder %s562_s14, %s562_s14 }
  0x2e   :  { %p569_p8 = por %p568_p7, %p567_p6 }
  0x30   :  { %p570_p9 = pnand %p569_p8, %p563_p5 }
  0x32   :  { %573 = shalt.err (!%p570_p9)
}
  0x33   :  { %51 = dma.hbm_to_vmem [thread:$0]  %s776_s3, 1024, %s46_s18, [#allocation6], %s627_s11, %s627_s11, %s628_s12  }
  0x34   :  { %s631_s16 = smov [#allocation8]   ;;  %s574_s21 = scalar_lea.hbm %s778_s5, 1024 }
  0x35   :  { %s59_s17 = sshll.u32 %s631_s16, 4  ;;  %p575_p10 = scmp.ne.s32.totalorder %s778_s5, %s574_s21  ;;  %s60_s17 = int_to_ptr.vmem [resolvable:$true] %s59_s17 }
  0x36   :  { %p578_p11 = scmp.lt.u32.totalorder %s574_s21, %s778_s5 }
  0x38   :  { %p580_p12 = pnand %p578_p11, %p575_p10 }
  0x3a   :  { %583 = shalt.err (!%p580_p12)
}
  0x3b   :  { %s584_s1 = scalar_lea.vmem %s60_s17, 1024  ;;  %p589_p0 = scmp.lt.s32.totalorder %s60_s17, %s60_s17 }
  0x3c   :  { %p585_p13 = scmp.ne.s32.totalorder %s60_s17, %s584_s1  ;;  %p590_p1 = scmp.lt.s32.totalorder %s584_s1, %s584_s1 }
  0x3e   :  { %p591_p2 = por %p590_p1, %p589_p0 }
  0x40   :  { %p592_p3 = pnand %p591_p2, %p585_p13 }
  0x42   :  { %595 = shalt.err (!%p592_p3)
}
  0x43   :  { %65 = dma.hbm_to_vmem [thread:$0]  %s778_s5, 1024, %s60_s17, [#allocation9], %s627_s11, %s627_s11, %s628_s12  }
  0x44   :  { %618 = dma.done.wait [#allocation3], 64  }
  0x45   :  { %619 = vsyncadd [#allocation3], 4294967232 }
  0x46   :  { %620 = dma.done.wait [#allocation6], 1152  }
  0x47   :  { %621 = vsyncadd [#allocation6], 4294966144 }
  0x48   :  { %622 = dma.done.wait [#allocation9], 1024  }
  0x49   :  { %623 = vsyncadd [#allocation9], 4294966272  ;;  %v632_v0 = vmov 0.0   ;;  %vm633_vm0 = vmmov 0   ;;  %v485_v1 = vld [vmem:[#allocation5] sm:$0xff]   ;;  %vm97_vm1 = vcmask 130048  }
  0x4a   :  { %430 = vmatprep.subr.bf16.mxu0 %v632_v0  ;;  %432 = vmatprep.mubr.msk.bf16.mxu0 %vm633_vm0, %v632_v0  ;;  %v81_v2 = vld [vmem:[#allocation2] sm:$0xf]  ;;  %v486_v3 = vld [vmem:[#allocation7] sm:$0xff]   ;;  %v487_v4 = vld [vmem:[#allocation7 + $0x8] sm:$0xff]  }
  0x4b   :  { %436 = vmatprep.subr.bf16.mxu1 %v632_v0  ;;  %452 = vmatprep.mubr.msk.bf16.mxu1 %vm633_vm0, %v632_v0  ;;  %v488_v5 = vld [vmem:[#allocation7 + $0x10] sm:$0xff]   ;;  %v489_v6 = vld [vmem:[#allocation7 + $0x18] sm:$0xff]   ;;  %v490_v7 = vld [vmem:[#allocation7 + $0x20] sm:$0xff]  }
  0x4c   :  { %431 = vmatpush3.bf16.msra.mxu0 %v485_v1  ;;  %437 = vmatpush3.bf16.msra.mxu1 %v486_v3  ;;  %v491_v8 = vld [vmem:[#allocation7 + $0x28] sm:$0xff]   ;;  %v492_v9 = vld [vmem:[#allocation7 + $0x30] sm:$0xff]   ;;  %v493_v10 = vld [vmem:[#allocation7 + $0x38] sm:$0xff]  }
  0x4d   :  { %456 = vmatprep.subr.bf16.mxu0 %v632_v0  ;;  %438 = vmatprep.subr.bf16.mxu1 %v632_v0  ;;  %v494_v11 = vld [vmem:[#allocation8] sm:$0xff]   ;;  %v495_v12 = vld [vmem:[#allocation8 + $0x8] sm:$0xff]   ;;  %v496_v13 = vld [vmem:[#allocation8 + $0x10] sm:$0xff]  }
  0x4e   :  { %v497_v14 = vld [vmem:[#allocation8 + $0x18] sm:$0xff]   ;;  %v389_v15 = vld [vmem:[%s775_s2] ss:$0 sm:$0xff]  ;;  %v498_v23 = vld [vmem:[#allocation8 + $0x20] sm:$0xff]  }
  0x4f   :  { %433 = vmatmul.mubr.msk.bf16.vlgmr.msra.gmra.mrb[0].mxu0 %vm97_vm1, %v81_v2  ;;  %v499_v24 = vld [vmem:[#allocation8 + $0x28] sm:$0xff]   ;;  %v500_v25 = vld [vmem:[#allocation8 + $0x30] sm:$0xff]   ;;  %v501_v26 = vld [vmem:[#allocation8 + $0x38] sm:$0xff]  }
  0x50   :  { %472 = vmatprep.mubr.msk.bf16.mxu0 %vm633_vm0, %v632_v0  ;;  %439 = vmatpush3.bf16.msra.mxu1 %v487_v4  ;;  %v392_v27 = vld [vmem:[%s777_s4] ss:$0 sm:$0xff]  ;;  %s634_s4 = smov [#allocation10]  }
  0x51   :  { %440 = vmatprep.subr.bf16.mxu1 %v632_v0  ;;  %457 = vmatpush3.bf16.msra.mxu0 %v494_v11  ;;  %v401_v35 = vld [vmem:[%s779_s6] ss:$0 sm:$0xff]  ;;  %s378_s28 = sshll.u32 %s634_s4, 4  ;;  %s379_s28 = int_to_ptr.vmem [resolvable:$true] %s378_s28 }
  0x52   :  { %458 = vmatprep.subr.bf16.mxu0 %v632_v0  ;;  %s596_s29 = scalar_lea.vmem %s379_s28, 128  ;;  %p601_p5 = scmp.lt.s32.totalorder %s379_s28, %s379_s28 }
  0x53   :  { %p597_p4 = scmp.ne.s32.totalorder %s379_s28, %s596_s29  ;;  %p602_p6 = scmp.lt.s32.totalorder %s596_s29, %s596_s29 }
  0x54   :  { %441 = vmatpush3.bf16.msra.mxu1 %v488_v5 }
  0x55   :  { %442 = vmatprep.subr.bf16.mxu1 %v632_v0  ;;  %459 = vmatpush3.bf16.msra.mxu0 %v495_v12  ;;  %p603_p7 = por %p602_p6, %p601_p5 }
  0x56   :  { %460 = vmatprep.subr.bf16.mxu0 %v632_v0 }
  0x57   :  { %p604_p8 = pnand %p603_p7, %p597_p4 }
  0x58   :  { %443 = vmatpush3.bf16.msra.mxu1 %v489_v6 }
  0x59   :  { %444 = vmatprep.subr.bf16.mxu1 %v632_v0  ;;  %461 = vmatpush3.bf16.msra.mxu0 %v496_v13 }
  0x5a   :  { %462 = vmatprep.subr.bf16.mxu0 %v632_v0 }
  0x5c   :  { %445 = vmatpush3.bf16.msra.mxu1 %v490_v7 }
  0x5d   :  { %446 = vmatprep.subr.bf16.mxu1 %v632_v0  ;;  %463 = vmatpush3.bf16.msra.mxu0 %v497_v14 }
  0x5e   :  { %464 = vmatprep.subr.bf16.mxu0 %v632_v0 }
  0x60   :  { %447 = vmatpush3.bf16.msra.mxu1 %v491_v8 }
  0x61   :  { %448 = vmatprep.subr.bf16.mxu1 %v632_v0  ;;  %465 = vmatpush3.bf16.msra.mxu0 %v498_v23 }
  0x62   :  { %466 = vmatprep.subr.bf16.mxu0 %v632_v0 }
  0x64   :  { %449 = vmatpush3.bf16.msra.mxu1 %v492_v9 }
  0x65   :  { %450 = vmatprep.subr.bf16.mxu1 %v632_v0  ;;  %467 = vmatpush3.bf16.msra.mxu0 %v499_v24 }
  0x66   :  { %468 = vmatprep.subr.bf16.mxu0 %v632_v0 }
  0x68   :  { %451 = vmatpush3.bf16.msra.mxu1 %v493_v10 }
  0x69   :  { %469 = vmatpush3.bf16.msra.mxu0 %v500_v25 }
  0x6a   :  { %470 = vmatprep.subr.bf16.mxu0 %v632_v0 }
  0x6d   :  { %471 = vmatpush3.bf16.msra.mxu0 %v501_v26 }
 0x122   :  { %v135_v16 = vpop.f32.mrb[0].mxu0 }
 0x123   :  { %v136_v17 = vadd.f32 %v389_v15, %v135_v16  ;;  %v434_v18 = vpop.f32.mrb[1].mxu0 }
 0x124   :  { %v138_v19 = vpop.f32.mrb[2].mxu0 }
 0x125   :  { %502 = vtanh.f32 %v136_v17  ;;  %v435_v20 = vpop.f32.mrb[3].mxu0 }
 0x12f   :  { %v503_v21 = vpop.eup %502 }
 0x130   :  { %v142_v22 = vpack.c.bf16 %v503_v21, %v503_v21 }
 0x132   :  { %453 = vmatmul.mubr.bf16.vlgmr.msra.gmra.mrb[0].mxu1 %v142_v22 }
 0x205   :  { %v248_v28 = vpop.f32.mrb[0].mxu1 }
 0x206   :  { %v249_v29 = vadd.f32 %v392_v27, %v248_v28  ;;  %v454_v30 = vpop.f32.mrb[1].mxu1 }
 0x207   :  { %v251_v31 = vpop.f32.mrb[2].mxu1 }
 0x208   :  { %504 = vtanh.f32 %v249_v29  ;;  %v455_v32 = vpop.f32.mrb[3].mxu1 }
 0x212   :  { %v505_v33 = vpop.eup %504 }
 0x213   :  { %v255_v34 = vpack.c.bf16 %v505_v33, %v505_v33 }
 0x215   :  { %473 = vmatmul.mubr.bf16.vlgmr.msra.gmra.mrb[4].mxu0 %v255_v34 }
 0x2e8   :  { %v361_v36 = vpop.f32.mrb[4].mxu0 }
 0x2e9   :  { %v362_v37 = vadd.f32 %v401_v35, %v361_v36  ;;  %v474_v38 = vpop.f32.mrb[5].mxu0 }
 0x2ea   :  { %v364_v39 = vpop.f32.mrb[6].mxu0 }
 0x2eb   :  { %v367_v40 = vmul.f32 0.5, %v362_v37  ;;  %v475_v41 = vpop.f32.mrb[7].mxu0 }
 0x2ed   :  { %506 = vtanh.f32 %v367_v40 }
 0x2f7   :  { %v507_v42 = vpop.eup %506 }
 0x2f8   :  { %v369_v43 = vadd.f32 1.0, %v507_v42 }
 0x2fa   :  { %v370_v44 = vmul.f32 0.5, %v369_v43 }
 0x2fc   :  { %371 = vst [vmem:[#allocation10] sm:$0xff] %v370_v44 }
 0x2fd   :  { %607 = shalt.err (!%p604_p8)
}
 0x2fe   :  { %s608_s8 = scalar_lea.hbm %s780_s7, 128 }
 0x2ff   :  { %p609_p9 = scmp.ne.s32.totalorder %s780_s7, %s608_s8  ;;  %p612_p10 = scmp.lt.u32.totalorder %s608_s8, %s780_s7 }
 0x301   :  { %p614_p11 = pnand %p612_p10, %p609_p9 }
 0x303   :  { %617 = shalt.err (!%p614_p11)
}
 0x304   :  { %381 = dma.vmem_to_hbm [thread:$0]  %s379_s28, 128, %s780_s7, [#allocation4]  }
 0x305   :  { %624 = dma.done.wait [#allocation4], 128  }
 0x306   :  { %625 = vsyncadd [#allocation4], 4294967168 }
 0x307   :  { %385 = vsyncpa [#allocation3], 1 }
 0x308   :  { %386 = vsyncpa [#allocation6], 1 }
 0x309   :  { %387 = vsyncpa [#allocation9], 1 }
 0x30a   :  { %388 = vsyncpa [#allocation4], 1 }

</bundles_post_ra>
